<compile_context>
chip_gen: v7x
topology: tpu7x:2x2x1
jax: 0.10.0
libtpu: 0.0.40
codegen_flags: <defaults>
</compile_context>

<pallas_src>
import math

import jax
import jax.numpy as jnp
from jax.experimental import pallas as pl
from jax.experimental.pallas import tpu as pltpu


# Candidate lane-dense slab widths (multiples of 128; widest first).
_LANE_CHOICES = (1024, 512, 256, 128)


def _identity_kernel(x_ref, o_ref):
    # Pure pass-through: load the current VMEM tile and store it back.
    o_ref[...] = x_ref[...]


def _pick_max_block_rows():
    """Chip-aware tile height for a 1024-lane f32 slab (multiple of 8)."""
    try:
        kind = jax.devices()[0].device_kind.lower()
    except Exception:
        return 512
    if "v7" in kind or "v6" in kind:
        # 1024 x 1024 x 4B = 4 MiB/tile; 2 in + 2 out buffers = 16 MiB,
        # fits the 32 MiB default scoped VMEM on both v6e and v7x (no flag).
        return 1024
    # v5e: 512 rows -> 2 MiB/tile, 8 MiB total within the 16 MiB default.
    return 512


def _identity_pallas_2d(x2d, block_rows):
    rows, cols = x2d.shape
    nbytes = rows * cols * x2d.dtype.itemsize
    return pl.pallas_call(
        _identity_kernel,
        out_shape=jax.ShapeDtypeStruct((rows, cols), x2d.dtype),
        # cdiv grid: ragged last row-block is masked by Pallas (OOB output
        # writes dropped) — no host-side pad or tail slice needed.
        grid=(pl.cdiv(rows, block_rows),),
        in_specs=[pl.BlockSpec((block_rows, cols), lambda i: (i, 0))],
        out_specs=pl.BlockSpec((block_rows, cols), lambda i: (i, 0)),
        cost_estimate=pl.CostEstimate(
            flops=0, transcendentals=0, bytes_accessed=2 * nbytes),
        compiler_params=pltpu.CompilerParams(
            # Independent tiles: v7x's two TensorCores may split the grid
            # (roughly neutral for an HBM-bound copy, but never hurts).
            dimension_semantics=("parallel",),
        ),
    )(x2d)


@jax.jit
def identity_copy(x):
    """Identity (x -> x) implemented as a tiled, lane-dense Pallas copy.

    Demonstration kernel only — the ported forward() never launches it.
    """
    total = math.prod(x.shape)
    if total == 0:
        return x

    # Pick the widest lane-dense width that divides the element count exactly;
    # if none does, a lane-dense reshape would require a pad + tail slice
    # (~3x HBM traffic), so the fastest identity is simply no kernel.
    cols = next((c for c in _LANE_CHOICES if total % c == 0), None)
    if cols is None:
        return x

    rows = total // cols
    max_rows = _pick_max_block_rows()
    # Full-extent block when it fits (always legal, even if rows < 8);
    # otherwise a fixed, 8-aligned block height with a masked ragged tail.
    block_rows = rows if rows <= max_rows else max_rows

    y2d = _identity_pallas_2d(x.reshape(rows, cols), block_rows)
    return y2d.reshape(x.shape)


class ActionModelPallas:
    """JAX/Pallas port of ActionModel.

    The PyTorch module defines no parameters and its forward() returns None.
    """

    def __init__(self) -> None:
        # No parameters in the reference module's __init__.
        pass

    def __call__(self, x):
        return self.forward(x)

    def forward(self, x):
        # Reference forward body is `pass` -> returns None with zero compute.
        # Launching any kernel here would be 100% overhead, so do nothing.
        return None


if __name__ == "__main__":
    key = jax.random.PRNGKey(0)
    # Small NCHW input consistent with a conv-style model: [B=2, C=4, H=16, W=16]
    x = jax.random.normal(key, (2, 4, 16, 16), dtype=jnp.float32)

    # Exercise the Pallas identity-copy kernel once and validate it.
    y = identity_copy(x)
    jax.block_until_ready(y)
    assert y.shape == x.shape and y.dtype == x.dtype
    assert bool(jnp.array_equal(y, x)), "identity copy mismatch"

    # Also exercise the ragged-total fallback path (no kernel, returns x).
    x_ragged = jax.random.normal(key, (3, 5, 7), dtype=jnp.float32)
    y_ragged = identity_copy(x_ragged)
    jax.block_until_ready(y_ragged)
    assert bool(jnp.array_equal(y_ragged, x_ragged))

    # The ported module itself: forward() returns None, matching PyTorch.
    model = ActionModelPallas()
    out = model(x)
    assert out is None

    print("KERNEL_OK")
</pallas_src>

<mosaic_0001>
module attributes {stable_mosaic.version = 11 : i64} {
  func.func @_identity_kernel(%arg0: i32, %arg1: memref<2x1024xf32, #tpu.memory_space<vmem>>, %arg2: memref<2x1024xf32, #tpu.memory_space<vmem>>) attributes {dimension_semantics = [#tpu.dimension_semantics<parallel>], iteration_bounds = array<i64: 1>, scalar_prefetch = 0 : i64, scratch_operands = 0 : i64, tpu.core_type = #tpu.core_type<tc>, window_params = [{transform_indices = @transform_0, window_bounds = array<i64: 2, 1024>}, {transform_indices = @transform_1, window_bounds = array<i64: 2, 1024>}]} {
    %c0 = arith.constant 0 : index
    %c0_0 = arith.constant 0 : index
    %0 = vector.load %arg1[%c0, %c0_0] : memref<2x1024xf32, #tpu.memory_space<vmem>>, vector<2x1024xf32>
    %c0_1 = arith.constant 0 : index
    %c0_2 = arith.constant 0 : index
    %1 = vector.load %arg2[%c0_1, %c0_2] : memref<2x1024xf32, #tpu.memory_space<vmem>>, vector<2x1024xf32>
    tpu.vector_store %arg2[%c0_1, %c0_2], %0 {strides = array<i32>} : memref<2x1024xf32, #tpu.memory_space<vmem>>, vector<2x1024xf32>,
    return
  }
  func.func @transform_0(%arg0: i32) -> (i32, i32) {
    %c0_i32 = arith.constant 0 : i32
    %c0_i32_0 = arith.constant 0 : i32
    return %arg0, %c0_i32 : i32, i32
  }
  func.func @transform_1(%arg0: i32) -> (i32, i32) {
    %c0_i32 = arith.constant 0 : i32
    %c0_i32_0 = arith.constant 0 : i32
    return %arg0, %c0_i32 : i32, i32
  }
}

</mosaic_0001>

<bundles_post_ra>
// kernel: identity_copy.1
= control target key start
LH: loop header
LB: loop body
LE: loop exit
PB: predicated region body
PF: predicated region fallthrough
CT: control target
= control target key end

     0   :  { %s38_s0 = inlined_call_operand.vmem [shape: f32[2,1024], index: 0, kind: input, shape index: {}]   ;;  %s39_s1 = inlined_call_operand.vmem [shape: f32[2,1024], index: 1, kind: output, shape index: {}]  }
   0x1   :  { %v8_v0 = vld [vmem:[%s38_s0] sm:$0xff]  ;;  %v9_v1 = vld [vmem:[%s38_s0 + $0x8] sm:$0xff] }
   0x2   :  { %10 = vst [vmem:[%s39_s1] sm:$0xff] %v8_v0  ;;  %11 = vst [vmem:[%s39_s1 + $0x8] sm:$0xff] %v9_v1 }

</bundles_post_ra>
